<compile_context>
chip_gen: v7x
topology: tpu7x:2x2x1
jax: 0.10.0
libtpu: 0.0.40
codegen_flags: <defaults>
</compile_context>

<pallas_src>
import math

import jax
import jax.numpy as jnp
import numpy as np
from jax.experimental import pallas as pl
from jax.experimental.pallas import tpu as pltpu


# ----------------------------- module constants ------------------------------
ACT_DIM = 7      # PostPredictor.act_dim
GRIP_DIM = 1     # PostPredictor.grip_dim
MODE_DIM = 1     # PostPredictor.mode_dim
OUT_DIM = ACT_DIM + GRIP_DIM + MODE_DIM   # 9
NEG_SLOPE = 0.2  # LeakyReLU slope used by spirl blocks
LANE = 128       # lane-dense feature padding; lane 127 reserved for the folded bias
ROW_TILE = 256   # M tile once the batch reaches one MXU's worth of rows (v6e/v7x width)


# ----------------------------- Pallas kernel --------------------------------
def postpredictor_kernel(x_ref, w_ref, o_ref):
    """Fully fused PostPredictor forward for one row tile.

    x_ref: (tm, din)        raw input rows (no wrapper-side padding)
    w_ref: (L, 128, 128)    per-layer weights, bias folded into row 127, W[127,127]=1 (except last)
    o_ref: (tm, 9)          final result written directly (no wrapper-side slice)

    Layer 0        : Predictor 'input'                      -> LeakyReLU(0.2)
    Layers 1..L-3  : Predictor 'pyramid-i'                  -> LeakyReLU(0.2)
    Layer  L-2     : Predictor 'head'                       -> identity
    Layer  L-1     : fused fc_act | fc_grip(+Tanh) | fc_mode(+Tanh)
    """
    x = x_ref[...]
    din = x.shape[-1]
    L = w_ref.shape[0]

    # Layer 0: fold the activation's zero-padding and constant-1 bias lane into the math:
    #   [x | 0 | 1] @ W0 == x @ W0[:din, :] + W0[127, :]   (W0[127,127]==1 re-creates the bias lane)
    w0 = w_ref[0]
    h = jnp.dot(x, w0[:din, :], preferred_element_type=jnp.float32) + w0[LANE - 1:LANE, :]
    h = jnp.where(h >= 0, h, NEG_SLOPE * h)                    # LeakyReLU(0.2)

    for l in range(1, L):   # static unroll; all matmuls hit the MXU, h stays in vregs/VMEM
        h = jnp.dot(h, w_ref[l], preferred_element_type=jnp.float32)
        if l < L - 2:
            h = jnp.where(h >= 0, h, NEG_SLOPE * h)            # LeakyReLU(0.2)
        elif l == L - 2:
            pass                                               # Predictor head: identity
        else:
            col = jax.lax.broadcasted_iota(jnp.int32, h.shape, 1)
            tanh_mask = (col >= ACT_DIM) & (col < OUT_DIM)     # grip + mode columns only
            h = jnp.where(tanh_mask, jnp.tanh(h), h)

    o_ref[...] = h[:, :OUT_DIM]                                # direct (tm, 9) store


# ----------------------------- parameter setup -------------------------------
def _xavier_uniform_linear(key, fan_in, fan_out, gain):
    a = gain * math.sqrt(6.0 / (fan_in + fan_out))
    # torch nn.Linear weight convention: (out_features, in_features)
    return jax.random.uniform(key, (fan_out, fan_in), jnp.float32, -a, a)


def make_postpredictor_params(key, *, input_size, mid_size, output_size, num_layers):
    """Mirrors PostPredictor.__init__ layer shapes; init_weights_xavier (relu gain, zero bias).

    Returns (ws, bs): per-layer torch-convention weights/biases, with the three heads
    already fused into one (9, output_size) matrix as the last entry.
    """
    gain = math.sqrt(2.0)  # nn.init.calculate_gain('relu')
    layer_dims = ([(input_size, mid_size)]
                  + [(mid_size, mid_size)] * num_layers
                  + [(mid_size, output_size)])
    ws, bs = [], []
    for (din, dout) in layer_dims:
        key, sub = jax.random.split(key)
        ws.append(_xavier_uniform_linear(sub, din, dout, gain))
        bs.append(jnp.zeros((dout,), jnp.float32))

    # heads: fc_act (->7), fc_grip (->1, tanh), fc_mode (->1, tanh), fused column-wise
    key, ka = jax.random.split(key)
    w_act = _xavier_uniform_linear(ka, output_size, ACT_DIM, gain)
    key, kg = jax.random.split(key)
    w_grip = _xavier_uniform_linear(kg, output_size, GRIP_DIM, gain)
    key, km = jax.random.split(key)
    w_mode = _xavier_uniform_linear(km, output_size, MODE_DIM, gain)
    ws.append(jnp.concatenate([w_act, w_grip, w_mode], axis=0))   # (9, output_size)
    bs.append(jnp.zeros((OUT_DIM,), jnp.float32))
    return ws, bs


def pack_weights(ws, bs):
    """Pack all layers into one lane-dense (L, 128, 128) tensor.

    Layout per layer:  W_pad[:din, :dout] = W.T ; W_pad[127, :dout] = bias ;
    W_pad[127, 127] = 1.0 (all but the last layer) so the constant-1 bias lane is carried
    to the next layer.  Done once at parameter-creation time (not in the jitted forward).
    """
    L = len(ws)
    w_all = np.zeros((L, LANE, LANE), np.float32)
    for l, (w, b) in enumerate(zip(ws, bs)):
        dout, din = w.shape
        assert din <= LANE - 1 and dout <= LANE - 1, "feature dims must fit in 127 lanes"
        w_all[l, :din, :dout] = np.asarray(w).T
        w_all[l, LANE - 1, :dout] = np.asarray(b)
        if l < L - 1:                      # last layer: keep padded output lanes exactly zero
            w_all[l, LANE - 1, LANE - 1] = 1.0
    return jnp.asarray(w_all)


# ----------------------------- forward (single fused kernel) -----------------
@jax.jit
def postpredictor_forward(x, w_all):
    """x: (B, input_size) f32 ; w_all: (L, 128, 128) packed weights -> (B, 9)."""
    B, din = x.shape
    L = int(w_all.shape[0])

    # Small batches: one full-array block (no padding).  Large batches: 256-row tiles stream
    # through the grid while the packed weights stay resident (constant index_map).
    tm = ROW_TILE if B >= ROW_TILE else B
    grid = (pl.cdiv(B, tm),)

    cost = pl.CostEstimate(
        flops=2 * B * LANE * LANE * L,
        transcendentals=B * (GRIP_DIM + MODE_DIM),
        bytes_accessed=int(w_all.size) * 4 + int(x.size) * 4 + B * OUT_DIM * 4,
    )

    return pl.pallas_call(
        postpredictor_kernel,
        out_shape=jax.ShapeDtypeStruct((B, OUT_DIM), jnp.float32),
        grid_spec=pltpu.PrefetchScalarGridSpec(
            num_scalar_prefetch=0,
            grid=grid,
            in_specs=[
                pl.BlockSpec((tm, din), lambda i: (i, 0)),            # row tiles stream
                pl.BlockSpec((L, LANE, LANE), lambda i: (0, 0, 0)),   # weights resident in VMEM
            ],
            out_specs=pl.BlockSpec((tm, OUT_DIM), lambda i: (i, 0)),
        ),
        compiler_params=pltpu.CompilerParams(dimension_semantics=("parallel",)),
        cost_estimate=cost,
    )(x, w_all)


# ----------------------------- reference (pure XLA) ---------------------------
def postpredictor_forward_ref(x, ws, bs):
    h = x
    n_mlp = len(ws) - 1                 # last entry is the fused heads matrix
    for l in range(n_mlp):
        h = jnp.dot(h, ws[l].T, precision=jax.lax.Precision.HIGHEST) + bs[l]
        if l < n_mlp - 1:               # 'input' + 'pyramid-i': LeakyReLU; 'head': identity
            h = jnp.where(h >= 0, h, NEG_SLOPE * h)
    out = jnp.dot(h, ws[-1].T, precision=jax.lax.Precision.HIGHEST) + bs[-1]
    a = out[:, :ACT_DIM]
    g = jnp.tanh(out[:, ACT_DIM:ACT_DIM + GRIP_DIM])
    m = jnp.tanh(out[:, ACT_DIM + GRIP_DIM:])
    return jnp.concatenate([a, g, m], axis=-1).reshape(-1, OUT_DIM)


if __name__ == "__main__":
    key = jax.random.PRNGKey(0)
    kx, kp, kb = jax.random.split(key, 3)

    # hp: input_size=32, nz_mid=32, output_size=32, n_processing_layers=3; batch=2
    B, input_size, mid_size, output_size, num_layers = 2, 32, 32, 32, 3

    ws, bs = make_postpredictor_params(kp, input_size=input_size, mid_size=mid_size,
                                       output_size=output_size, num_layers=num_layers)
    w_all = pack_weights(ws, bs)          # packed once, outside the jitted forward

    # --- small-batch path (single block, matches the module's typical call) ---
    x = jax.random.normal(kx, (B, input_size), jnp.float32)
    out = jax.block_until_ready(postpredictor_forward(x, w_all))
    assert out.shape == (B, OUT_DIM), out.shape
    ref = postpredictor_forward_ref(x, ws, bs)
    np.testing.assert_allclose(np.asarray(out), np.asarray(ref), rtol=2e-3, atol=2e-3)

    # --- batched-M path: multiple row tiles per call (weights DMA'd once; "parallel" grid
    #     axis lets v7x split tiles across its two TensorCores); exercises a partial edge tile.
    xb = jax.random.normal(kb, (300, input_size), jnp.float32)
    outb = jax.block_until_ready(postpredictor_forward(xb, w_all))
    refb = postpredictor_forward_ref(xb, ws, bs)
    np.testing.assert_allclose(np.asarray(outb), np.asarray(refb), rtol=2e-3, atol=2e-3)

    print("KERNEL_OK")
</pallas_src>

<mosaic_0001>
module attributes {stable_mosaic.version = 11 : i64} {
  func.func @postpredictor_kernel(%arg0: i32, %arg1: memref<2x32xf32, #tpu.memory_space<vmem>>, %arg2: memref<6x128x128xf32, #tpu.memory_space<vmem>>, %arg3: memref<2x9xf32, #tpu.memory_space<vmem>>) attributes {dimension_semantics = [#tpu.dimension_semantics<parallel>], iteration_bounds = array<i64: 1>, scalar_prefetch = 0 : i64, scratch_operands = 0 : i64, tpu.core_type = #tpu.core_type<tc>, window_params = [{transform_indices = @transform_0, window_bounds = array<i64: 2, 32>}, {pipeline_mode = #tpu.pipeline_mode<synchronous>, transform_indices = @transform_1, window_bounds = array<i64: 6, 128, 128>}, {transform_indices = @transform_2, window_bounds = array<i64: 2, 9>}]} {
    %c0 = arith.constant 0 : index
    %c0_0 = arith.constant 0 : index
    %0 = vector.load %arg1[%c0, %c0_0] : memref<2x32xf32, #tpu.memory_space<vmem>>, vector<2x32xf32>
    %c0_1 = arith.constant 0 : index
    %c0_2 = arith.constant 0 : index
    %c0_3 = arith.constant 0 : index
    %1 = vector.load %arg2[%c0_1, %c0_2, %c0_3] : memref<6x128x128xf32, #tpu.memory_space<vmem>>, vector<1x128x128xf32>
    %2 = vector.shape_cast %1 : vector<1x128x128xf32> to vector<128x128xf32>
    %3 = vector.extract_strided_slice %2 {offsets = [0, 0], sizes = [32, 128], strides = [1, 1]} : vector<128x128xf32> to vector<32x128xf32>
    %cst = arith.constant dense<0.000000e+00> : vector<2x128xf32>
    %4 = tpu.matmul %0, %3, %cst {dimension_numbers = #tpu.dot_dimension_numbers<[1], [0], [0], [1], [0, 0, 1, 1], [], []>} : vector<2x32xf32>, vector<32x128xf32>, vector<2x128xf32> -> vector<2x128xf32>
    %5 = vector.extract_strided_slice %2 {offsets = [127, 0], sizes = [1, 128], strides = [1, 1]} : vector<128x128xf32> to vector<1x128xf32>
    %6 = vector.broadcast %5 : vector<1x128xf32> to vector<2x128xf32>
    %7 = arith.addf %4, %6 : vector<2x128xf32>
    %cst_4 = arith.constant 0.000000e+00 : f32
    %8 = vector.broadcast %cst_4 : f32 to vector<2x128xf32>
    %9 = arith.cmpf oge, %7, %8 : vector<2x128xf32>
    %cst_5 = arith.constant 2.000000e-01 : f32
    %10 = vector.broadcast %cst_5 : f32 to vector<2x128xf32>
    %11 = arith.mulf %10, %7 : vector<2x128xf32>
    %12 = arith.select %9, %7, %11 : vector<2x128xi1>, vector<2x128xf32>
    %c1 = arith.constant 1 : index
    %c0_6 = arith.constant 0 : index
    %c0_7 = arith.constant 0 : index
    %13 = vector.load %arg2[%c1, %c0_6, %c0_7] : memref<6x128x128xf32, #tpu.memory_space<vmem>>, vector<1x128x128xf32>
    %14 = vector.shape_cast %13 : vector<1x128x128xf32> to vector<128x128xf32>
    %cst_8 = arith.constant dense<0.000000e+00> : vector<2x128xf32>
    %15 = tpu.matmul %12, %14, %cst_8 {dimension_numbers = #tpu.dot_dimension_numbers<[1], [0], [0], [1], [0, 0, 1, 1], [], []>} : vector<2x128xf32>, vector<128x128xf32>, vector<2x128xf32> -> vector<2x128xf32>
    %cst_9 = arith.constant 0.000000e+00 : f32
    %16 = vector.broadcast %cst_9 : f32 to vector<2x128xf32>
    %17 = arith.cmpf oge, %15, %16 : vector<2x128xf32>
    %cst_10 = arith.constant 2.000000e-01 : f32
    %18 = vector.broadcast %cst_10 : f32 to vector<2x128xf32>
    %19 = arith.mulf %18, %15 : vector<2x128xf32>
    %20 = arith.select %17, %15, %19 : vector<2x128xi1>, vector<2x128xf32>
    %c2 = arith.constant 2 : index
    %c0_11 = arith.constant 0 : index
    %c0_12 = arith.constant 0 : index
    %21 = vector.load %arg2[%c2, %c0_11, %c0_12] : memref<6x128x128xf32, #tpu.memory_space<vmem>>, vector<1x128x128xf32>
    %22 = vector.shape_cast %21 : vector<1x128x128xf32> to vector<128x128xf32>
    %cst_13 = arith.constant dense<0.000000e+00> : vector<2x128xf32>
    %23 = tpu.matmul %20, %22, %cst_13 {dimension_numbers = #tpu.dot_dimension_numbers<[1], [0], [0], [1], [0, 0, 1, 1], [], []>} : vector<2x128xf32>, vector<128x128xf32>, vector<2x128xf32> -> vector<2x128xf32>
    %cst_14 = arith.constant 0.000000e+00 : f32
    %24 = vector.broadcast %cst_14 : f32 to vector<2x128xf32>
    %25 = arith.cmpf oge, %23, %24 : vector<2x128xf32>
    %cst_15 = arith.constant 2.000000e-01 : f32
    %26 = vector.broadcast %cst_15 : f32 to vector<2x128xf32>
    %27 = arith.mulf %26, %23 : vector<2x128xf32>
    %28 = arith.select %25, %23, %27 : vector<2x128xi1>, vector<2x128xf32>
    %c3 = arith.constant 3 : index
    %c0_16 = arith.constant 0 : index
    %c0_17 = arith.constant 0 : index
    %29 = vector.load %arg2[%c3, %c0_16, %c0_17] : memref<6x128x128xf32, #tpu.memory_space<vmem>>, vector<1x128x128xf32>
    %30 = vector.shape_cast %29 : vector<1x128x128xf32> to vector<128x128xf32>
    %cst_18 = arith.constant dense<0.000000e+00> : vector<2x128xf32>
    %31 = tpu.matmul %28, %30, %cst_18 {dimension_numbers = #tpu.dot_dimension_numbers<[1], [0], [0], [1], [0, 0, 1, 1], [], []>} : vector<2x128xf32>, vector<128x128xf32>, vector<2x128xf32> -> vector<2x128xf32>
    %cst_19 = arith.constant 0.000000e+00 : f32
    %32 = vector.broadcast %cst_19 : f32 to vector<2x128xf32>
    %33 = arith.cmpf oge, %31, %32 : vector<2x128xf32>
    %cst_20 = arith.constant 2.000000e-01 : f32
    %34 = vector.broadcast %cst_20 : f32 to vector<2x128xf32>
    %35 = arith.mulf %34, %31 : vector<2x128xf32>
    %36 = arith.select %33, %31, %35 : vector<2x128xi1>, vector<2x128xf32>
    %c4 = arith.constant 4 : index
    %c0_21 = arith.constant 0 : index
    %c0_22 = arith.constant 0 : index
    %37 = vector.load %arg2[%c4, %c0_21, %c0_22] : memref<6x128x128xf32, #tpu.memory_space<vmem>>, vector<1x128x128xf32>
    %38 = vector.shape_cast %37 : vector<1x128x128xf32> to vector<128x128xf32>
    %cst_23 = arith.constant dense<0.000000e+00> : vector<2x128xf32>
    %39 = tpu.matmul %36, %38, %cst_23 {dimension_numbers = #tpu.dot_dimension_numbers<[1], [0], [0], [1], [0, 0, 1, 1], [], []>} : vector<2x128xf32>, vector<128x128xf32>, vector<2x128xf32> -> vector<2x128xf32>
    %c5 = arith.constant 5 : index
    %c0_24 = arith.constant 0 : index
    %c0_25 = arith.constant 0 : index
    %40 = vector.load %arg2[%c5, %c0_24, %c0_25] : memref<6x128x128xf32, #tpu.memory_space<vmem>>, vector<1x128x128xf32>
    %41 = vector.shape_cast %40 : vector<1x128x128xf32> to vector<128x128xf32>
    %cst_26 = arith.constant dense<0.000000e+00> : vector<2x128xf32>
    %42 = tpu.matmul %39, %41, %cst_26 {dimension_numbers = #tpu.dot_dimension_numbers<[1], [0], [0], [1], [0, 0, 1, 1], [], []>} : vector<2x128xf32>, vector<128x128xf32>, vector<2x128xf32> -> vector<2x128xf32>
    %43 = tpu.iota {dimensions = array<i32: 1>} : vector<2x128xi32>
    %c7_i32 = arith.constant 7 : i32
    %44 = vector.broadcast %c7_i32 : i32 to vector<2x128xi32>
    %45 = arith.cmpi sge, %43, %44 : vector<2x128xi32>
    %c9_i32 = arith.constant 9 : i32
    %46 = vector.broadcast %c9_i32 : i32 to vector<2x128xi32>
    %47 = arith.cmpi slt, %43, %46 : vector<2x128xi32>
    %48 = arith.andi %45, %47 : vector<2x128xi1>
    %49 = math.tanh %42 : vector<2x128xf32>
    %50 = arith.select %48, %49, %42 : vector<2x128xi1>, vector<2x128xf32>
    %51 = vector.extract_strided_slice %50 {offsets = [0, 0], sizes = [2, 9], strides = [1, 1]} : vector<2x128xf32> to vector<2x9xf32>
    %c0_27 = arith.constant 0 : index
    %c0_28 = arith.constant 0 : index
    %52 = vector.load %arg3[%c0_27, %c0_28] : memref<2x9xf32, #tpu.memory_space<vmem>>, vector<2x9xf32>
    tpu.vector_store %arg3[%c0_27, %c0_28], %51 {strides = array<i32>} : memref<2x9xf32, #tpu.memory_space<vmem>>, vector<2x9xf32>,
    return
  }
  func.func @transform_0(%arg0: i32) -> (i32, i32) {
    %c0_i32 = arith.constant 0 : i32
    %c0_i32_0 = arith.constant 0 : i32
    return %arg0, %c0_i32 : i32, i32
  }
  func.func @transform_1(%arg0: i32) -> (i32, i32, i32) {
    %c0_i32 = arith.constant 0 : i32
    %c0_i32_0 = arith.constant 0 : i32
    %c0_i32_1 = arith.constant 0 : i32
    %c0_i32_2 = arith.constant 0 : i32
    return %c0_i32, %c0_i32_0, %c0_i32_1 : i32, i32, i32
  }
  func.func @transform_2(%arg0: i32) -> (i32, i32) {
    %c0_i32 = arith.constant 0 : i32
    %c0_i32_0 = arith.constant 0 : i32
    return %arg0, %c0_i32 : i32, i32
  }
}

</mosaic_0001>

<bundles_post_ra>
// kernel: postpredictor_forward.1
= control target key start
LH: loop header
LB: loop body
LE: loop exit
PB: predicated region body
PF: predicated region fallthrough
CT: control target
= control target key end

     0   :  { %7 = vsyncpa [#allocation3], 0  ;;  %s1201_s0 = inlined_call_operand.hbm [shape: f32[2,32], index: 0, kind: input, shape index: {}]   ;;  %s1202_s1 = inlined_call_operand.hbm [shape: f32[6,128,128], index: 1, kind: input, shape index: {}]   ;;  %s1203_s2 = inlined_call_operand.hbm [shape: f32[2,9], index: 2, kind: output, shape index: {}]  }
   0x1   :  { %8 = vsyncpa [#allocation6], 0 }
   0x2   :  { %9 = vsyncpa [#allocation4], 0  ;;  %s1079_s9 = smov [#allocation2]   ;;  %s1080_s11 = smov [#allocation5]  }
   0x3   :  { %s16_s10 = sshll.u32 %s1079_s9, 4  ;;  %s25_s12 = sshll.u32 %s1080_s11, 4  ;;  %s17_s10 = int_to_ptr.vmem [resolvable:$true] %s16_s10  ;;  %s1102_s12 = int_to_ptr.vmem [resolvable:$true] %s25_s12 }
   0x4   :  { %s1007_s15 = scalar_lea.hbm %s1201_s0, 32 }
   0x5   :  { %p1008_p0 = scmp.ne.s32.totalorder %s1201_s0, %s1007_s15  ;;  %p1011_p1 = scmp.lt.u32.totalorder %s1007_s15, %s1201_s0 }
   0x7   :  { %p1013_p2 = pnand %p1011_p1, %p1008_p0 }
   0x9   :  { %1016 = shalt.err (!%p1013_p2)
}
   0xa   :  { %s1017_s20 = scalar_lea.vmem %s17_s10, 32  ;;  %p1022_p4 = scmp.lt.s32.totalorder %s17_s10, %s17_s10 }
   0xb   :  { %p1018_p3 = scmp.ne.s32.totalorder %s17_s10, %s1017_s20  ;;  %p1023_p5 = scmp.lt.s32.totalorder %s1017_s20, %s1017_s20 }
   0xd   :  { %p1024_p6 = por %p1023_p5, %p1022_p4 }
   0xf   :  { %p1025_p7 = pnand %p1024_p6, %p1018_p3 }
  0x11   :  { %1028 = shalt.err (!%p1025_p7)
}
  0x12   :  { %19 = dma.hbm_to_vmem [thread:$0]  %s1201_s0, 32, %s17_s10, [#allocation3]  }
  0x13   :  { %s1029_s25 = scalar_lea.hbm %s1202_s1, 12288 }
  0x14   :  { %p1030_p8 = scmp.ne.s32.totalorder %s1202_s1, %s1029_s25  ;;  %p1033_p9 = scmp.lt.u32.totalorder %s1029_s25, %s1202_s1 }
  0x16   :  { %p1035_p10 = pnand %p1033_p9, %p1030_p8 }
  0x18   :  { %1038 = shalt.err (!%p1035_p10)
}
  0x19   :  { %s1039_s30 = scalar_lea.vmem %s1102_s12, 12288  ;;  %p1044_p12 = scmp.lt.s32.totalorder %s1102_s12, %s1102_s12 }
  0x1a   :  { %p1040_p11 = scmp.ne.s32.totalorder %s1102_s12, %s1039_s30  ;;  %p1045_p13 = scmp.lt.s32.totalorder %s1039_s30, %s1039_s30 }
  0x1c   :  { %p1046_p0 = por %p1045_p13, %p1044_p12 }
  0x1e   :  { %p1047_p1 = pnand %p1046_p0, %p1040_p11 }
  0x20   :  { %1050 = shalt.err (!%p1047_p1)
}
  0x21   :  { %s1081_s0 = smov 128   ;;  %s1082_s3 = smov 8  }
  0x22   :  { %31 = dma.hbm_to_vmem [thread:$0]  %s1202_s1, 12288, %s1102_s12, [#allocation6], %s1081_s0, %s1081_s0, %s1082_s3  }
  0x23   :  { %1073 = dma.done.wait [#allocation3], 32  }
  0x24   :  { %1074 = vsyncadd [#allocation3], 4294967264 }
  0x25   :  { %1075 = dma.done.wait [#allocation6], 12288  }
  0x26   :  { %1076 = vsyncadd [#allocation6], 4294955008  ;;  %v1083_v0 = vmov 0.0|0.0   ;;  %vm1084_vm0 = vmmov 0   ;;  %v1085_v1 = vmov 0.0   ;;  %v39_v2 = vld [vmem:[#allocation5] sm:$0xff]  ;;  %v44_v54 = vlaneseq }
  0x27   :  { %871 = vmatprep.subr.bf16.mxu0 %v1083_v0  ;;  %693 = vmatprep.mubr.msk.f32.mxu0 %vm1084_vm0, %v1085_v1  ;;  %v40_v3 = vld [vmem:[#allocation5 + $0x8] sm:$0xff]  ;;  %v41_v4 = vld [vmem:[#allocation5 + $0x10] sm:$0xff]  ;;  %v42_v6 = vld [vmem:[#allocation5 + $0x18] sm:$0xff]  ;;  %vm48_vm1 = vcmask 261120   ;;  %s1086_s1 = smov [#allocation7]   ;;  %vm576_vm9 = vcmask 66560  }
  0x28   :  { %877 = vmatprep.subr.bf16.mxu1 %v1083_v0  ;;  %728 = vmatprep.mubr.msk.f32.mxu1 %vm1084_vm0, %v1085_v1  ;;  %v872_v5 = vpack.c.bf16 %v40_v3, %v39_v2  ;;  %v126_v7 = vld [vmem:[#allocation5 + $0x80] sm:$0xff]  ;;  %v127_v8 = vld [vmem:[#allocation5 + $0x88] sm:$0xff]  ;;  %v128_v9 = vld [vmem:[#allocation5 + $0x90] sm:$0xff]  ;;  %v875_v11 = vpack.c.bf16 %v42_v6, %v41_v4  ;;  %v45_v55 = vshrl.u32 %v44_v54, 7  ;;  %s584_s6 = sshll.u32 %s1086_s1, 4  ;;  %s585_s6 = int_to_ptr.vmem [resolvable:$true] %s584_s6 }
  0x29   :  { %v129_v10 = vld [vmem:[#allocation5 + $0x98] sm:$0xff]  ;;  %v878_v12 = vpack.c.bf16 %v127_v8, %v126_v7  ;;  %v130_v14 = vld [vmem:[#allocation5 + $0xa0] sm:$0xff]  ;;  %v131_v15 = vld [vmem:[#allocation5 + $0xa8] sm:$0xff]  ;;  %s1051_s7 = scalar_lea.vmem %s585_s6, 32  ;;  %p1056_p3 = scmp.lt.s32.totalorder %s585_s6, %s585_s6 }
  0x2a   :  { %873 = vmatpush3.bf16.msra.mxu0 %v872_v5  ;;  %v881_v13 = vpack.c.bf16 %v129_v10, %v128_v9  ;;  %v38_v16 = vld [vmem:[#allocation2] sm:$0x3]  ;;  %v884_v17 = vpack.c.bf16 %v131_v15, %v130_v14  ;;  %v132_v18 = vld [vmem:[#allocation5 + $0xb0] sm:$0xff]  ;;  %v134_v21 = vld [vmem:[#allocation5 + $0xc0] sm:$0xff]  ;;  %v46_v56 = vsub.s32 7, %v45_v55  ;;  %p1052_p2 = scmp.ne.s32.totalorder %s585_s6, %s1051_s7  ;;  %p1057_p4 = scmp.lt.s32.totalorder %s1051_s7, %s1051_s7 }
  0x2b   :  { %874 = vmatprep.subr.bf16.mxu0 %v1083_v0  ;;  %879 = vmatpush3.bf16.msra.mxu1 %v878_v12  ;;  %v133_v19 = vld [vmem:[#allocation5 + $0xb8] sm:$0xff]  ;;  %v135_v22 = vld [vmem:[#allocation5 + $0xc8] sm:$0xff]  ;;  %v136_v24 = vld [vmem:[#allocation5 + $0xd0] sm:$0xff] }
  0x2c   :  { %880 = vmatprep.subr.bf16.mxu1 %v1083_v0  ;;  %v887_v20 = vpack.c.bf16 %v133_v19, %v132_v18  ;;  %v890_v23 = vpack.c.bf16 %v135_v22, %v134_v21  ;;  %v137_v25 = vld [vmem:[#allocation5 + $0xd8] sm:$0xff]  ;;  %v138_v27 = vld [vmem:[#allocation5 + $0xe0] sm:$0xff]  ;;  %v139_v28 = vld [vmem:[#allocation5 + $0xe8] sm:$0xff]  ;;  %p1058_p5 = por %p1057_p4, %p1056_p3 }
  0x2d   :  { %v893_v26 = vpack.c.bf16 %v137_v25, %v136_v24  ;;  %v896_v29 = vpack.c.bf16 %v139_v28, %v138_v27  ;;  %v140_v30 = vld [vmem:[#allocation5 + $0xf0] sm:$0xff]  ;;  %v141_v31 = vld [vmem:[#allocation5 + $0xf8] sm:$0xff]  ;;  %v216_v33 = vld [vmem:[#allocation5 + $0x100] sm:$0xff] }
  0x2e   :  { %876 = vmatpush3.bf16.msra.mxu0 %v875_v11  ;;  %v899_v32 = vpack.c.bf16 %v141_v31, %v140_v30  ;;  %v217_v34 = vld [vmem:[#allocation5 + $0x108] sm:$0xff]  ;;  %v218_v35 = vld [vmem:[#allocation5 + $0x110] sm:$0xff]  ;;  %v219_v37 = vld [vmem:[#allocation5 + $0x118] sm:$0xff]  ;;  %p1059_p6 = pnand %p1058_p5, %p1052_p2 }
  0x2f   :  { %901 = vmatprep.subr.bf16.mxu0 %v1083_v0  ;;  %882 = vmatpush3.bf16.msra.mxu1 %v881_v13  ;;  %v902_v36 = vpack.c.bf16 %v217_v34, %v216_v33  ;;  %v905_v38 = vpack.c.bf16 %v219_v37, %v218_v35  ;;  %v220_v39 = vld [vmem:[#allocation5 + $0x120] sm:$0xff]  ;;  %v221_v40 = vld [vmem:[#allocation5 + $0x128] sm:$0xff]  ;;  %v222_v42 = vld [vmem:[#allocation5 + $0x130] sm:$0xff] }
  0x30   :  { %883 = vmatprep.subr.bf16.mxu1 %v1083_v0  ;;  %v908_v41 = vpack.c.bf16 %v221_v40, %v220_v39  ;;  %v223_v43 = vld [vmem:[#allocation5 + $0x138] sm:$0xff]  ;;  %v224_v45 = vld [vmem:[#allocation5 + $0x140] sm:$0xff]  ;;  %v225_v46 = vld [vmem:[#allocation5 + $0x148] sm:$0xff] }
  0x31   :  { %694 = vmatmul.mubr.msk.f32.vlgmr.msra.gmra.mrb[0].mxu0 %vm48_vm1, %v38_v16  ;;  %v911_v44 = vpack.c.bf16 %v223_v43, %v222_v42  ;;  %v914_v47 = vpack.c.bf16 %v225_v46, %v224_v45  ;;  %v226_v48 = vld [vmem:[#allocation5 + $0x150] sm:$0xff]  ;;  %v227_v49 = vld [vmem:[#allocation5 + $0x158] sm:$0xff]  ;;  %v228_v51 = vld [vmem:[#allocation5 + $0x160] sm:$0xff] }
  0x32   :  { %763 = vmatprep.mubr.msk.f32.mxu0 %vm1084_vm0, %v1085_v1  ;;  %903 = vmatpush3.bf16.msra.mxu0 %v902_v36  ;;  %v917_v50 = vpack.c.bf16 %v227_v49, %v226_v48  ;;  %v229_v52 = vld [vmem:[#allocation5 + $0x168] sm:$0xff]  ;;  %v43_v57 = vld [vmem:[#allocation5 + $0x78] sm:$0xff]  ;;  %v230_v2 = vld [vmem:[#allocation5 + $0x170] sm:$0xff] }
  0x33   :  { %885 = vmatpush3.bf16.msra.mxu1 %v884_v17  ;;  %904 = vmatprep.subr.bf16.mxu0 %v1083_v0  ;;  %v920_v53 = vpack.c.bf16 %v229_v52, %v228_v51  ;;  %v47_v58 = vrot.slane %v43_v57, %v46_v56  ;;  %v231_v3 = vld [vmem:[#allocation5 + $0x178] sm:$0xff]  ;;  %v306_v5 = vld [vmem:[#allocation5 + $0x180] sm:$0xff]  ;;  %v307_v6 = vld [vmem:[#allocation5 + $0x188] sm:$0xff] }
  0x34   :  { %886 = vmatprep.subr.bf16.mxu1 %v1083_v0  ;;  %v923_v4 = vpack.c.bf16 %v231_v3, %v230_v2  ;;  %v308_v7 = vld [vmem:[#allocation5 + $0x190] sm:$0xff]  ;;  %v926_v8 = vpack.c.bf16 %v307_v6, %v306_v5  ;;  %v309_v9 = vld [vmem:[#allocation5 + $0x198] sm:$0xff]  ;;  %v310_v11 = vld [vmem:[#allocation5 + $0x1a0] sm:$0xff] }
  0x35   :  { %v929_v10 = vpack.c.bf16 %v309_v9, %v308_v7  ;;  %v311_v12 = vld [vmem:[#allocation5 + $0x1a8] sm:$0xff]  ;;  %v312_v14 = vld [vmem:[#allocation5 + $0x1b0] sm:$0xff]  ;;  %v313_v15 = vld [vmem:[#allocation5 + $0x1b8] sm:$0xff] }
  0x36   :  { %906 = vmatpush3.bf16.msra.mxu0 %v905_v38  ;;  %v932_v13 = vpack.c.bf16 %v311_v12, %v310_v11  ;;  %v935_v16 = vpack.c.bf16 %v313_v15, %v312_v14  ;;  %v314_v17 = vld [vmem:[#allocation5 + $0x1c0] sm:$0xff]  ;;  %v315_v18 = vld [vmem:[#allocation5 + $0x1c8] sm:$0xff]  ;;  %v317_v21 = vld [vmem:[#allocation5 + $0x1d8] sm:$0xff] }
  0x37   :  { %888 = vmatpush3.bf16.msra.mxu1 %v887_v20  ;;  %907 = vmatprep.subr.bf16.mxu0 %v1083_v0  ;;  %v938_v19 = vpack.c.bf16 %v315_v18, %v314_v17  ;;  %v316_v20 = vld [vmem:[#allocation5 + $0x1d0] sm:$0xff]  ;;  %v319_v24 = vld [vmem:[#allocation5 + $0x1e8] sm:$0xff]  ;;  %v321_v31 = vld [vmem:[#allocation5 + $0x1f8] sm:$0xff] }
  0x38   :  { %889 = vmatprep.subr.bf16.mxu1 %v1083_v0  ;;  %v941_v22 = vpack.c.bf16 %v317_v21, %v316_v20  ;;  %v320_v30 = vld [vmem:[#allocation5 + $0x1f0] sm:$0xff]  ;;  %v396_v33 = vld [vmem:[#allocation5 + $0x200] sm:$0xff]  ;;  %v397_v34 = vld [vmem:[#allocation5 + $0x208] sm:$0xff] }
  0x39   :  { %v398_v35 = vld [vmem:[#allocation5 + $0x210] sm:$0xff]  ;;  %v950_v36 = vpack.c.bf16 %v397_v34, %v396_v33  ;;  %v399_v37 = vld [vmem:[#allocation5 + $0x218] sm:$0xff]  ;;  %v400_v39 = vld [vmem:[#allocation5 + $0x220] sm:$0xff] }
  0x3a   :  { %909 = vmatpush3.bf16.msra.mxu0 %v908_v41  ;;  %v953_v38 = vpack.c.bf16 %v399_v37, %v398_v35  ;;  %v401_v40 = vld [vmem:[#allocation5 + $0x228] sm:$0xff]  ;;  %v402_v42 = vld [vmem:[#allocation5 + $0x230] sm:$0xff]  ;;  %v403_v43 = vld [vmem:[#allocation5 + $0x238] sm:$0xff] }
  0x3b   :  { %891 = vmatpush3.bf16.msra.mxu1 %v890_v23  ;;  %910 = vmatprep.subr.bf16.mxu0 %v1083_v0  ;;  %v318_v23 = vld [vmem:[#allocation5 + $0x1e0] sm:$0xff]  ;;  %v956_v41 = vpack.c.bf16 %v401_v40, %v400_v39  ;;  %v405_v46 = vld [vmem:[#allocation5 + $0x248] sm:$0xff]  ;;  %v406_v48 = vld [vmem:[#allocation5 + $0x250] sm:$0xff] }
  0x3c   :  { %892 = vmatprep.subr.bf16.mxu1 %v1083_v0  ;;  %v944_v25 = vpack.c.bf16 %v319_v24, %v318_v23  ;;  %v404_v45 = vld [vmem:[#allocation5 + $0x240] sm:$0xff]  ;;  %v407_v49 = vld [vmem:[#allocation5 + $0x258] sm:$0xff]  ;;  %v409_v52 = vld [vmem:[#allocation5 + $0x268] sm:$0xff] }
  0x3d   :  { %v408_v51 = vld [vmem:[#allocation5 + $0x260] sm:$0xff]  ;;  %v485_v2 = vld [vmem:[#allocation5 + $0x290] sm:$0xff]  ;;  %v488_v7 = vld [vmem:[#allocation5 + $0x2a8] sm:$0xff] }
  0x3e   :  { %912 = vmatpush3.bf16.msra.mxu0 %v911_v44  ;;  %v959_v44 = vpack.c.bf16 %v403_v43, %v402_v42  ;;  %v487_v6 = vld [vmem:[#allocation5 + $0x2a0] sm:$0xff]  ;;  %v490_v9 = vld [vmem:[#allocation5 + $0x2b8] sm:$0xff]  ;;  %v492_v12 = vld [vmem:[#allocation5 + $0x2c8] sm:$0xff] }
  0x3f   :  { %894 = vmatpush3.bf16.msra.mxu1 %v893_v26  ;;  %913 = vmatprep.subr.bf16.mxu0 %v1083_v0  ;;  %v491_v11 = vld [vmem:[#allocation5 + $0x2c0] sm:$0xff]  ;;  %v493_v14 = vld [vmem:[#allocation5 + $0x2d0] sm:$0xff]  ;;  %v494_v15 = vld [vmem:[#allocation5 + $0x2d8] sm:$0xff] }
  0x40   :  { %895 = vmatprep.subr.bf16.mxu1 %v1083_v0  ;;  %v495_v17 = vld [vmem:[#allocation5 + $0x2e0] sm:$0xff]  ;;  %v496_v18 = vld [vmem:[#allocation5 + $0x2e8] sm:$0xff]  ;;  %v497_v20 = vld [vmem:[#allocation5 + $0x2f0] sm:$0xff] }
  0x41   :  { %v498_v21 = vld [vmem:[#allocation5 + $0x2f8] sm:$0xff] }
  0x42   :  { %915 = vmatpush3.bf16.msra.mxu0 %v914_v47  ;;  %v962_v47 = vpack.c.bf16 %v405_v46, %v404_v45 }
  0x43   :  { %897 = vmatpush3.bf16.msra.mxu1 %v896_v29  ;;  %916 = vmatprep.subr.bf16.mxu0 %v1083_v0 }
  0x44   :  { %898 = vmatprep.subr.bf16.mxu1 %v1083_v0 }
  0x46   :  { %918 = vmatpush3.bf16.msra.mxu0 %v917_v50  ;;  %v965_v50 = vpack.c.bf16 %v407_v49, %v406_v48 }
  0x47   :  { %900 = vmatpush3.bf16.msra.mxu1 %v899_v32  ;;  %919 = vmatprep.subr.bf16.mxu0 %v1083_v0  ;;  %v947_v32 = vpack.c.bf16 %v321_v31, %v320_v30  ;;  %v570_v31 = vand.u32 127, %v44_v54 }
  0x48   :  { %925 = vmatprep.subr.bf16.mxu1 %v1083_v0 }
  0x49   :  { %vm571_vm6 = vcmp.ge.s32.totalorder %v570_v31, 7  ;;  %vm572_vm7 = vcmp.lt.s32.totalorder %v570_v31, 9 }
  0x4a   :  { %921 = vmatpush3.bf16.msra.mxu0 %v920_v53  ;;  %v968_v53 = vpack.c.bf16 %v409_v52, %v408_v51  ;;  %vm573_vm8 = vmand %vm571_vm6, %vm572_vm7 }
  0x4b   :  { %922 = vmatprep.subr.bf16.mxu0 %v1083_v0 }
  0x4e   :  { %924 = vmatpush3.bf16.msra.mxu0 %v923_v4  ;;  %v486_v4 = vld [vmem:[#allocation5 + $0x298] sm:$0xff] }
  0x4f   :  { %949 = vmatprep.subr.bf16.mxu0 %v1083_v0  ;;  %v977_v5 = vpack.c.bf16 %v486_v4, %v485_v2 }
 0x104   :  { %v118_v59 = vpop.f32.mrb[0].mxu0 }
 0x105   :  { %v119_v60 = vadd.f32 %v118_v59, %v47_v58  ;;  %v695_v61 = vpop.f32.mrb[1].mxu0  ;;  %v410_v59 = vld [vmem:[#allocation5 + $0x270] sm:$0xff] }
 0x107   :  { %v123_v62 = vmul.f32 0.2, %v119_v60  ;;  %vm122_vm2 = vcmp.ge.f32.partialorder %v119_v60, 0.0 }
 0x109   :  { %v124_v63 = vsel %vm122_vm2, %v119_v60, %v123_v62  ;;  %v411_v60 = vld [vmem:[#allocation5 + $0x278] sm:$0xff]  ;;  %v483_v62 = vld [vmem:[#allocation5 + $0x280] sm:$0xff] }
 0x10a   :  { %729 = vmatmul.mubr.f32.vlgmr.msra.gmra.mrb[0].mxu1 %v124_v63  ;;  %v971_v61 = vpack.c.bf16 %v411_v60, %v410_v59  ;;  %v484_v63 = vld [vmem:[#allocation5 + $0x288] sm:$0xff] }
 0x10b   :  { %798 = vmatprep.mubr.msk.f32.mxu1 %vm1084_vm0, %v1085_v1  ;;  %927 = vmatpush3.bf16.msra.mxu1 %v926_v8  ;;  %v974_v3 = vpack.c.bf16 %v484_v63, %v483_v62  ;;  %v980_v8 = vpack.c.bf16 %v488_v7, %v487_v6 }
 0x10c   :  { %928 = vmatprep.subr.bf16.mxu1 %v1083_v0 }
 0x10f   :  { %930 = vmatpush3.bf16.msra.mxu1 %v929_v10 }
 0x110   :  { %931 = vmatprep.subr.bf16.mxu1 %v1083_v0 }
 0x113   :  { %933 = vmatpush3.bf16.msra.mxu1 %v932_v13  ;;  %v986_v13 = vpack.c.bf16 %v492_v12, %v491_v11 }
 0x114   :  { %934 = vmatprep.subr.bf16.mxu1 %v1083_v0 }
 0x117   :  { %936 = vmatpush3.bf16.msra.mxu1 %v935_v16  ;;  %v989_v16 = vpack.c.bf16 %v494_v15, %v493_v14 }
 0x118   :  { %937 = vmatprep.subr.bf16.mxu1 %v1083_v0 }
 0x11b   :  { %939 = vmatpush3.bf16.msra.mxu1 %v938_v19  ;;  %v992_v19 = vpack.c.bf16 %v496_v18, %v495_v17 }
 0x11c   :  { %940 = vmatprep.subr.bf16.mxu1 %v1083_v0 }
 0x11f   :  { %942 = vmatpush3.bf16.msra.mxu1 %v941_v22  ;;  %v995_v22 = vpack.c.bf16 %v498_v21, %v497_v20 }
 0x120   :  { %943 = vmatprep.subr.bf16.mxu1 %v1083_v0 }
 0x123   :  { %945 = vmatpush3.bf16.msra.mxu1 %v944_v25 }
 0x124   :  { %946 = vmatprep.subr.bf16.mxu1 %v1083_v0 }
 0x127   :  { %948 = vmatpush3.bf16.msra.mxu1 %v947_v32 }
 0x128   :  { %973 = vmatprep.subr.bf16.mxu1 %v1083_v0 }
 0x1dd   :  { %v208_v26 = vpop.f32.mrb[0].mxu1 }
 0x1de   :  { %vm212_vm3 = vcmp.ge.f32.partialorder %v208_v26, 0.0  ;;  %v213_v27 = vmul.f32 0.2, %v208_v26  ;;  %v730_v28 = vpop.f32.mrb[1].mxu1 }
 0x1e0   :  { %v214_v29 = vsel %vm212_vm3, %v208_v26, %v213_v27 }
 0x1e1   :  { %764 = vmatmul.mubr.f32.vlgmr.msra.gmra.mrb[2].mxu0 %v214_v29 }
 0x1e2   :  { %833 = vmatprep.mubr.msk.f32.mxu0 %vm1084_vm0, %v1085_v1  ;;  %951 = vmatpush3.bf16.msra.mxu0 %v950_v36 }
 0x1e3   :  { %952 = vmatprep.subr.bf16.mxu0 %v1083_v0 }
 0x1e6   :  { %954 = vmatpush3.bf16.msra.mxu0 %v953_v38 }
 0x1e7   :  { %955 = vmatprep.subr.bf16.mxu0 %v1083_v0 }
 0x1ea   :  { %957 = vmatpush3.bf16.msra.mxu0 %v956_v41 }
 0x1eb   :  { %958 = vmatprep.subr.bf16.mxu0 %v1083_v0 }
 0x1ee   :  { %960 = vmatpush3.bf16.msra.mxu0 %v959_v44 }
 0x1ef   :  { %961 = vmatprep.subr.bf16.mxu0 %v1083_v0 }
 0x1f2   :  { %963 = vmatpush3.bf16.msra.mxu0 %v962_v47 }
 0x1f3   :  { %964 = vmatprep.subr.bf16.mxu0 %v1083_v0 }
 0x1f6   :  { %966 = vmatpush3.bf16.msra.mxu0 %v965_v50 }
 0x1f7   :  { %967 = vmatprep.subr.bf16.mxu0 %v1083_v0 }
 0x1fa   :  { %969 = vmatpush3.bf16.msra.mxu0 %v968_v53 }
 0x1fb   :  { %970 = vmatprep.subr.bf16.mxu0 %v1083_v0 }
 0x1fe   :  { %972 = vmatpush3.bf16.msra.mxu0 %v971_v61 }
 0x2b4   :  { %v298_v55 = vpop.f32.mrb[2].mxu0 }
 0x2b5   :  { %vm302_vm4 = vcmp.ge.f32.partialorder %v298_v55, 0.0  ;;  %v303_v56 = vmul.f32 0.2, %v298_v55  ;;  %v765_v57 = vpop.f32.mrb[3].mxu0 }
 0x2b7   :  { %v304_v58 = vsel %vm302_vm4, %v298_v55, %v303_v56 }
 0x2b8   :  { %799 = vmatmul.mubr.f32.vlgmr.msra.gmra.mrb[2].mxu1 %v304_v58 }
 0x2b9   :  { %868 = vmatprep.mubr.msk.f32.mxu1 %vm1084_vm0, %v1085_v1  ;;  %975 = vmatpush3.bf16.msra.mxu1 %v974_v3  ;;  %v489_v1 = vld [vmem:[#allocation5 + $0x2b0] sm:$0xff] }
 0x2ba   :  { %976 = vmatprep.subr.bf16.mxu1 %v1083_v0  ;;  %v983_v10 = vpack.c.bf16 %v490_v9, %v489_v1 }
 0x2bd   :  { %978 = vmatpush3.bf16.msra.mxu1 %v977_v5 }
 0x2be   :  { %979 = vmatprep.subr.bf16.mxu1 %v1083_v0 }
 0x2c1   :  { %981 = vmatpush3.bf16.msra.mxu1 %v980_v8 }
 0x2c2   :  { %982 = vmatprep.subr.bf16.mxu1 %v1083_v0 }
 0x2c5   :  { %984 = vmatpush3.bf16.msra.mxu1 %v983_v10 }
 0x2c6   :  { %985 = vmatprep.subr.bf16.mxu1 %v1083_v0 }
 0x2c9   :  { %987 = vmatpush3.bf16.msra.mxu1 %v986_v13 }
 0x2ca   :  { %988 = vmatprep.subr.bf16.mxu1 %v1083_v0 }
 0x2cd   :  { %990 = vmatpush3.bf16.msra.mxu1 %v989_v16 }
 0x2ce   :  { %991 = vmatprep.subr.bf16.mxu1 %v1083_v0 }
 0x2d1   :  { %993 = vmatpush3.bf16.msra.mxu1 %v992_v19 }
 0x2d2   :  { %994 = vmatprep.subr.bf16.mxu1 %v1083_v0 }
 0x2d5   :  { %996 = vmatpush3.bf16.msra.mxu1 %v995_v22 }
 0x38b   :  { %v388_v23 = vpop.f32.mrb[2].mxu1 }
 0x38c   :  { %vm392_vm5 = vcmp.ge.f32.partialorder %v388_v23, 0.0  ;;  %v393_v24 = vmul.f32 0.2, %v388_v23  ;;  %v800_v25 = vpop.f32.mrb[3].mxu1 }
 0x38e   :  { %v394_v26 = vsel %vm392_vm5, %v388_v23, %v393_v24 }
 0x38f   :  { %834 = vmatmul.mubr.f32.vlgmr.msra.gmra.mrb[4].mxu0 %v394_v26 }
 0x462   :  { %v478_v27 = vpop.f32.mrb[4].mxu0 }
 0x463   :  { %v835_v28 = vpop.f32.mrb[5].mxu0  ;;  %869 = vmatmul.mubr.f32.vlgmr.msra.gmra.mrb[4].mxu1 %v478_v27 }
 0x536   :  { %v565_v29 = vpop.f32.mrb[4].mxu1 }
 0x537   :  { %1005 = vtanh.f32 %v565_v29  ;;  %v870_v30 = vpop.f32.mrb[5].mxu1 }
 0x541   :  { %v1006_v0 = vpop.eup %1005 }
 0x542   :  { %v575_v32 = vsel %vm573_vm8, %v1006_v0, %v565_v29 }
 0x543   :  { %577 = vst.msk [vmem:[#allocation7] sm:$0x3] %vm576_vm9, %v575_v32 }
 0x544   :  { %1062 = shalt.err (!%p1059_p6)
}
 0x545   :  { %s1063_s10 = scalar_lea.hbm %s1203_s2, 32 }
 0x546   :  { %p1064_p7 = scmp.ne.s32.totalorder %s1203_s2, %s1063_s10  ;;  %p1067_p8 = scmp.lt.u32.totalorder %s1063_s10, %s1203_s2 }
 0x548   :  { %p1069_p9 = pnand %p1067_p8, %p1064_p7 }
 0x54a   :  { %1072 = shalt.err (!%p1069_p9)
}
 0x54b   :  { %587 = dma.vmem_to_hbm [thread:$0]  %s585_s6, 32, %s1203_s2, [#allocation4]  }
 0x54c   :  { %1077 = dma.done.wait [#allocation4], 32  }
 0x54d   :  { %1078 = vsyncadd [#allocation4], 4294967264 }
 0x54e   :  { %591 = vsyncpa [#allocation3], 1 }
 0x54f   :  { %592 = vsyncpa [#allocation6], 1 }
 0x550   :  { %593 = vsyncpa [#allocation4], 1 }

</bundles_post_ra>
